<compile_context>
chip_gen: v7x
topology: tpu7x:2x2x1
jax: 0.10.0
libtpu: 0.0.40
codegen_flags: <defaults>
</compile_context>

<pallas_src>
import functools

import jax
import jax.numpy as jnp
from jax.experimental import pallas as pl
from jax.experimental.pallas import tpu as pltpu

LANES = 128
TILE_ROWS_MAX = 4096        # 4096x128 f32 = 2 MiB/block; 3 inputs x 2 buffers = 12 MiB VMEM
NUM_SHARDS = 2              # outer "parallel" axis (v7x megacore); harmless on 1-TC chips
VMEM_LIMIT_BYTES = 40 * 1024 * 1024   # headroom over the 12-13 MiB we actually use


def _round_up(x, m):
    return ((x + m - 1) // m) * m


def _mse_var_kernel(mean_ref, logstd_ref, target_ref, out_ref, acc_ref, *,
                    var_weight, lam_w, n_valid, tile_rows, tiles_per_shard):
    p = pl.program_id(0)          # shard index ("parallel")
    i = pl.program_id(1)          # tile index within shard ("arbitrary")

    # Reset the vector accumulator at the start of each shard.
    @pl.when(i == 0)
    def _():
        acc_ref[...] = jnp.zeros_like(acc_ref)

    m = mean_ref[...].astype(jnp.float32)
    s = logstd_ref[...].astype(jnp.float32)
    t = target_ref[...].astype(jnp.float32)

    var = (2.0 * var_weight) * s
    diff = m - t
    loss = 0.5 * (jnp.exp(-var) * diff * diff + var)

    # Mask out (a) lane padding in the last row, (b) undefined rows of a partial edge
    # block, and (c) whole "virtual" tiles of a ragged shard split — all reduce to
    # "global element index >= n_valid".  Note gidx uses the UNclamped tile index, so
    # virtual tiles (whose DMA is clamped to the last real tile) are fully masked and
    # never double-counted.
    tile_idx = p * tiles_per_shard + i
    row0 = tile_idx * tile_rows
    row_ids = jax.lax.broadcasted_iota(jnp.int32, (tile_rows, LANES), 0)
    lane_ids = jax.lax.broadcasted_iota(jnp.int32, (tile_rows, LANES), 1)
    gidx = (row0 + row_ids) * LANES + lane_ids
    loss = jnp.where(gidx < n_valid, loss, 0.0)

    # Vreg-resident accumulation: fold the tile's rows into the (8,128) accumulator with
    # pure VPU vreg adds — no per-step cross-lane reduce, no per-step SMEM round trip.
    acc_ref[...] += loss.reshape(tile_rows // 8, 8, LANES).sum(axis=0)

    # Finalize this shard: single cross-lane reduce, then scale by lam_w / N.
    @pl.when(i == pl.num_programs(1) - 1)
    def _():
        out_ref[0, 0] = (lam_w / n_valid) * jnp.sum(acc_ref[...])


def mse_var_loss(mean, logstd, target, var_weight=1.0, lam_w=1.0,
                 tile_rows_max=TILE_ROWS_MAX):
    assert mean.shape == logstd.shape == target.shape
    n = int(mean.size)

    def to_slab(x):
        # Flatten row-major; keep native dtype (the kernel casts). Only pad when the
        # element count is not a multiple of 128 lanes (<=127 extra elements).
        x = x.reshape(-1)
        rem = x.shape[0] % LANES
        if rem:
            x = jnp.pad(x, (0, LANES - rem))
        return x.reshape(-1, LANES)

    m2, s2, t2 = to_slab(mean), to_slab(logstd), to_slab(target)
    rows = m2.shape[0]

    tile_rows = min(int(tile_rows_max), _round_up(rows, 8))
    tile_rows = _round_up(tile_rows, 8)
    num_tiles = -(-rows // tile_rows)
    num_shards = NUM_SHARDS if num_tiles >= NUM_SHARDS else 1
    tiles_per_shard = -(-num_tiles // num_shards)

    kernel = functools.partial(
        _mse_var_kernel,
        var_weight=float(var_weight),
        lam_w=float(lam_w),
        n_valid=n,
        tile_rows=tile_rows,
        tiles_per_shard=tiles_per_shard,
    )

    def in_index(p, i):
        # Clamp "virtual" tiles of a ragged shard split onto the last real tile; their
        # contribution is masked to zero inside the kernel, so no fully-OOB DMA happens.
        return (jnp.minimum(p * tiles_per_shard + i, num_tiles - 1), 0)

    in_spec = pl.BlockSpec((tile_rows, LANES), in_index)

    partials = pl.pallas_call(
        kernel,
        out_shape=jax.ShapeDtypeStruct((num_shards, 1), jnp.float32),
        grid_spec=pltpu.PrefetchScalarGridSpec(
            num_scalar_prefetch=0,
            grid=(num_shards, tiles_per_shard),
            in_specs=[in_spec, in_spec, in_spec],
            out_specs=pl.BlockSpec((1, 1), lambda p, i: (p, 0),
                                   memory_space=pltpu.SMEM),
            scratch_shapes=[pltpu.VMEM((8, LANES), jnp.float32)],
        ),
        compiler_params=pltpu.CompilerParams(
            dimension_semantics=("parallel", "arbitrary"),
            vmem_limit_bytes=VMEM_LIMIT_BYTES),
    )(m2, s2, t2)

    return jnp.sum(partials)


def _reference(mean, logstd, target, var_weight=1.0, lam_w=1.0):
    var = var_weight * logstd.astype(jnp.float32) * 2.0
    diff = mean.astype(jnp.float32) - target.astype(jnp.float32)
    loss = 0.5 * (jnp.exp(-var) * diff * diff + var)
    return lam_w * jnp.mean(loss)


if __name__ == "__main__":
    key = jax.random.PRNGKey(0)

    def check(shape, var_weight=1.0, lam_w=1.0, tile_rows_max=TILE_ROWS_MAX):
        k1, k2, k3 = jax.random.split(jax.random.fold_in(key, sum(shape)), 3)
        mean = jax.random.normal(k1, shape, dtype=jnp.float32)
        logstd = 0.1 * jax.random.normal(k2, shape, dtype=jnp.float32)
        target = jax.random.normal(k3, shape, dtype=jnp.float32)
        got = jax.block_until_ready(
            mse_var_loss(mean, logstd, target, var_weight, lam_w,
                         tile_rows_max=tile_rows_max))
        ref = _reference(mean, logstd, target, var_weight, lam_w)
        assert jnp.allclose(got, ref, rtol=1e-5, atol=1e-5), (shape, got, ref)

    # NCHW shape matching the PyTorch module's conv-style inputs.
    check((2, 4, 16, 16))
    # Ragged element count (exercises the lane-tail pad + in-kernel masking path).
    check((3, 5, 9, 11), var_weight=0.7, lam_w=1.3)
    # Multi-tile, two-shard streaming path with a ragged shard split (one virtual tile)
    # and a partial last block — force small tiles so the path is covered at small size.
    check((4, 8, 96, 96), tile_rows_max=1024)
    # Default (large-tile) streaming configuration.
    check((4, 8, 96, 96), var_weight=0.9, lam_w=2.0)

    print("KERNEL_OK")
</pallas_src>

<mosaic_0001>
module attributes {stable_mosaic.version = 11 : i64} {
  func.func @_mse_var_kernel(%arg0: i32, %arg1: i32, %arg2: memref<16x128xf32, #tpu.memory_space<vmem>>, %arg3: memref<16x128xf32, #tpu.memory_space<vmem>>, %arg4: memref<16x128xf32, #tpu.memory_space<vmem>>, %arg5: memref<1x1xf32, #tpu.memory_space<smem>>, %arg6: memref<8x128xf32, #tpu.memory_space<vmem>>) attributes {dimension_semantics = [#tpu.dimension_semantics<parallel>, #tpu.dimension_semantics<arbitrary>], iteration_bounds = array<i64: 1, 1>, scalar_prefetch = 0 : i64, scratch_operands = 1 : i64, tpu.core_type = #tpu.core_type<tc>, window_params = [{transform_indices = @transform_0, window_bounds = array<i64: 16, 128>}, {transform_indices = @transform_1, window_bounds = array<i64: 16, 128>}, {transform_indices = @transform_2, window_bounds = array<i64: 16, 128>}, {transform_indices = @transform_3, window_bounds = array<i64: 1, 1>}]} {
    %c0_i32 = arith.constant 0 : i32
    %0 = arith.cmpi eq, %arg1, %c0_i32 : i32
    %1 = arith.extui %0 : i1 to i32
    %c0_i32_0 = arith.constant 0 : i32
    %2 = arith.cmpi ne, %1, %c0_i32_0 : i32
    scf.if %2 {
      %cst_16 = arith.constant 0.000000e+00 : f32
      %39 = vector.broadcast %cst_16 : f32 to vector<8x128xf32>
      %c0_17 = arith.constant 0 : index
      %c0_18 = arith.constant 0 : index
      %40 = vector.load %arg6[%c0_17, %c0_18] : memref<8x128xf32, #tpu.memory_space<vmem>>, vector<8x128xf32>
      tpu.vector_store %arg6[%c0_17, %c0_18], %39 {strides = array<i32>} : memref<8x128xf32, #tpu.memory_space<vmem>>, vector<8x128xf32>,
    } else {
    }
    %c0 = arith.constant 0 : index
    %c0_1 = arith.constant 0 : index
    %3 = vector.load %arg2[%c0, %c0_1] : memref<16x128xf32, #tpu.memory_space<vmem>>, vector<16x128xf32>
    %c0_2 = arith.constant 0 : index
    %c0_3 = arith.constant 0 : index
    %4 = vector.load %arg3[%c0_2, %c0_3] : memref<16x128xf32, #tpu.memory_space<vmem>>, vector<16x128xf32>
    %c0_4 = arith.constant 0 : index
    %c0_5 = arith.constant 0 : index
    %5 = vector.load %arg4[%c0_4, %c0_5] : memref<16x128xf32, #tpu.memory_space<vmem>>, vector<16x128xf32>
    %cst = arith.constant 2.000000e+00 : f32
    %6 = vector.broadcast %cst : f32 to vector<16x128xf32>
    %7 = arith.mulf %6, %4 : vector<16x128xf32>
    %8 = arith.subf %3, %5 : vector<16x128xf32>
    %cst_6 = arith.constant 0.000000e+00 : f32
    %9 = vector.broadcast %cst_6 : f32 to vector<16x128xf32>
    %10 = arith.subf %9, %7 : vector<16x128xf32>
    %11 = math.exp %10 : vector<16x128xf32>
    %12 = arith.mulf %11, %8 : vector<16x128xf32>
    %13 = arith.mulf %12, %8 : vector<16x128xf32>
    %14 = arith.addf %13, %7 : vector<16x128xf32>
    %cst_7 = arith.constant 5.000000e-01 : f32
    %15 = vector.broadcast %cst_7 : f32 to vector<16x128xf32>
    %16 = arith.mulf %15, %14 : vector<16x128xf32>
    %c1_i32 = arith.constant 1 : i32
    %17 = arith.muli %arg0, %c1_i32 : i32
    %18 = arith.addi %17, %arg1 : i32
    %c16_i32 = arith.constant 16 : i32
    %19 = arith.muli %18, %c16_i32 : i32
    %20 = tpu.iota {dimensions = array<i32: 0>} : vector<16x128xi32>
    %21 = tpu.iota {dimensions = array<i32: 1>} : vector<16x128xi32>
    %22 = vector.broadcast %19 : i32 to vector<16x128xi32>
    %23 = arith.addi %22, %20 : vector<16x128xi32>
    %c128_i32 = arith.constant 128 : i32
    %24 = vector.broadcast %c128_i32 : i32 to vector<16x128xi32>
    %25 = arith.muli %23, %24 : vector<16x128xi32>
    %26 = arith.addi %25, %21 : vector<16x128xi32>
    %c2048_i32 = arith.constant 2048 : i32
    %27 = vector.broadcast %c2048_i32 : i32 to vector<16x128xi32>
    %28 = arith.cmpi slt, %26, %27 : vector<16x128xi32>
    %cst_8 = arith.constant 0.000000e+00 : f32
    %29 = vector.broadcast %cst_8 : f32 to vector<16x128xf32>
    %30 = arith.select %28, %16, %29 : vector<16x128xi1>, vector<16x128xf32>
    %c0_9 = arith.constant 0 : index
    %c0_10 = arith.constant 0 : index
    %31 = vector.load %arg6[%c0_9, %c0_10] : memref<8x128xf32, #tpu.memory_space<vmem>>, vector<8x128xf32>
    %32 = vector.shape_cast %30 : vector<16x128xf32> to vector<2x8x128xf32>
    %cst_11 = arith.constant dense<0.000000e+00> : vector<8x128xf32>
    %33 = vector.multi_reduction <add>, %32, %cst_11 [0] : vector<2x8x128xf32> to vector<8x128xf32>
    %34 = arith.addf %31, %33 : vector<8x128xf32>
    %c0_12 = arith.constant 0 : index
    %c0_13 = arith.constant 0 : index
    %35 = vector.load %arg6[%c0_12, %c0_13] : memref<8x128xf32, #tpu.memory_space<vmem>>, vector<8x128xf32>
    tpu.vector_store %arg6[%c0_12, %c0_13], %34 {strides = array<i32>} : memref<8x128xf32, #tpu.memory_space<vmem>>, vector<8x128xf32>,
    %c0_i32_14 = arith.constant 0 : i32
    %36 = arith.cmpi eq, %arg1, %c0_i32_14 : i32
    %37 = arith.extui %36 : i1 to i32
    %c0_i32_15 = arith.constant 0 : i32
    %38 = arith.cmpi ne, %37, %c0_i32_15 : i32
    scf.if %38 {
      %c0_16 = arith.constant 0 : index
      %c0_17 = arith.constant 0 : index
      %39 = vector.load %arg6[%c0_16, %c0_17] : memref<8x128xf32, #tpu.memory_space<vmem>>, vector<8x128xf32>
      %40 = vector.shape_cast %39 : vector<8x128xf32> to vector<1x8x128xf32>
      %cst_18 = arith.constant dense<0.000000e+00> : vector<1xf32>
      %41 = vector.multi_reduction <add>, %40, %cst_18 [1, 2] : vector<1x8x128xf32> to vector<1xf32>
      %42 = vector.shape_cast %41 : vector<1xf32> to vector<1x1x1xf32>
      %43 = vector.extract %42[0, 0, 0] : f32 from vector<1x1x1xf32>
      %cst_19 = arith.constant 4.8828125E-4 : f32
      %44 = arith.mulf %cst_19, %43 : f32
      %c0_20 = arith.constant 0 : index
      %c0_21 = arith.constant 0 : index
      %45 = memref.load %arg5[%c0_20, %c0_21] : memref<1x1xf32, #tpu.memory_space<smem>>
      memref.store %44, %arg5[%c0_20, %c0_21] : memref<1x1xf32, #tpu.memory_space<smem>>
    } else {
    }
    return
  }
  func.func @transform_0(%arg0: i32, %arg1: i32) -> (i32, i32) {
    %c1_i32 = arith.constant 1 : i32
    %0 = arith.muli %arg0, %c1_i32 : i32
    %1 = arith.addi %0, %arg1 : i32
    %c0_i32 = arith.constant 0 : i32
    %2 = arith.minsi %1, %c0_i32 : i32
    %c0_i32_0 = arith.constant 0 : i32
    %c0_i32_1 = arith.constant 0 : i32
    return %2, %c0_i32_0 : i32, i32
  }
  func.func @transform_1(%arg0: i32, %arg1: i32) -> (i32, i32) {
    %c1_i32 = arith.constant 1 : i32
    %0 = arith.muli %arg0, %c1_i32 : i32
    %1 = arith.addi %0, %arg1 : i32
    %c0_i32 = arith.constant 0 : i32
    %2 = arith.minsi %1, %c0_i32 : i32
    %c0_i32_0 = arith.constant 0 : i32
    %c0_i32_1 = arith.constant 0 : i32
    return %2, %c0_i32_0 : i32, i32
  }
  func.func @transform_2(%arg0: i32, %arg1: i32) -> (i32, i32) {
    %c1_i32 = arith.constant 1 : i32
    %0 = arith.muli %arg0, %c1_i32 : i32
    %1 = arith.addi %0, %arg1 : i32
    %c0_i32 = arith.constant 0 : i32
    %2 = arith.minsi %1, %c0_i32 : i32
    %c0_i32_0 = arith.constant 0 : i32
    %c0_i32_1 = arith.constant 0 : i32
    return %2, %c0_i32_0 : i32, i32
  }
  func.func @transform_3(%arg0: i32, %arg1: i32) -> (i32, i32) {
    %c0_i32 = arith.constant 0 : i32
    %c0_i32_0 = arith.constant 0 : i32
    return %arg0, %c0_i32 : i32, i32
  }
}

</mosaic_0001>

<bundles_post_ra>
// kernel: tpu_custom_call.1
= control target key start
LH: loop header
LB: loop body
LE: loop exit
PB: predicated region body
PF: predicated region fallthrough
CT: control target
= control target key end

     0   :  { %8 = vsyncpa [#allocation4], 0  ;;  %s358_s0 = inlined_call_operand.hbm [shape: f32[16,128], index: 0, kind: input, shape index: {}]   ;;  %s359_s1 = inlined_call_operand.hbm [shape: f32[16,128], index: 1, kind: input, shape index: {}]   ;;  %s360_s2 = inlined_call_operand.hbm [shape: f32[16,128], index: 2, kind: input, shape index: {}]   ;;  %s361_s3 = inlined_call_operand.hbm [shape: f32[1,1], index: 3, kind: output, shape index: {}]  }
   0x1   :  { %9 = vsyncpa [#allocation7], 0 }
   0x2   :  { %10 = vsyncpa [#allocation5], 0  ;;  %s268_s12 = smov [#allocation6]   ;;  %s269_s14 = smov [#allocation3]  }
   0x3   :  { %s40_s13 = sshll.u32 %s268_s12, 4  ;;  %s22_s15 = sshll.u32 %s269_s14, 4  ;;  %s41_s13 = int_to_ptr.vmem [resolvable:$true] %s40_s13  ;;  %s294_s15 = int_to_ptr.vmem [resolvable:$true] %s22_s15 }
   0x4   :  { %s186_s18 = scalar_lea.hbm %s359_s1, 256 }
   0x5   :  { %p187_p0 = scmp.ne.s32.totalorder %s359_s1, %s186_s18  ;;  %p190_p1 = scmp.lt.u32.totalorder %s186_s18, %s359_s1 }
   0x7   :  { %p192_p2 = pnand %p190_p1, %p187_p0 }
   0x9   :  { %195 = shalt.err (!%p192_p2)
}
   0xa   :  { %s196_s23 = scalar_lea.vmem %s41_s13, 256  ;;  %p201_p4 = scmp.lt.s32.totalorder %s41_s13, %s41_s13 }
   0xb   :  { %p197_p3 = scmp.ne.s32.totalorder %s41_s13, %s196_s23  ;;  %p202_p5 = scmp.lt.s32.totalorder %s196_s23, %s196_s23 }
   0xd   :  { %p203_p6 = por %p202_p5, %p201_p4 }
   0xf   :  { %p204_p7 = pnand %p203_p6, %p197_p3 }
  0x11   :  { %207 = shalt.err (!%p204_p7)
}
  0x12   :  { %s270_s24 = smov 128   ;;  %s271_s25 = smov 8  }
  0x13   :  { %46 = dma.hbm_to_vmem [thread:$0]  %s359_s1, 256, %s41_s13, [#allocation7], %s270_s24, %s270_s24, %s271_s25  }
  0x14   :  { %s208_s30 = scalar_lea.hbm %s358_s0, 256 }
  0x15   :  { %p209_p8 = scmp.ne.s32.totalorder %s358_s0, %s208_s30  ;;  %p212_p9 = scmp.lt.u32.totalorder %s208_s30, %s358_s0 }
  0x17   :  { %p214_p10 = pnand %p212_p9, %p209_p8 }
  0x19   :  { %217 = shalt.err (!%p214_p10)
}
  0x1a   :  { %s218_s8 = scalar_lea.vmem %s294_s15, 256  ;;  %p223_p12 = scmp.lt.s32.totalorder %s294_s15, %s294_s15 }
  0x1b   :  { %p219_p11 = scmp.ne.s32.totalorder %s294_s15, %s218_s8  ;;  %p224_p13 = scmp.lt.s32.totalorder %s218_s8, %s218_s8 }
  0x1d   :  { %p225_p0 = por %p224_p13, %p223_p12 }
  0x1f   :  { %p226_p1 = pnand %p225_p0, %p219_p11 }
  0x21   :  { %229 = shalt.err (!%p226_p1)
}
  0x22   :  { %28 = dma.hbm_to_vmem [thread:$0]  %s358_s0, 256, %s294_s15, [#allocation4], %s270_s24, %s270_s24, %s271_s25  }
  0x23   :  { %s272_s10 = smov [#allocation8]   ;;  %s230_s14 = scalar_lea.hbm %s360_s2, 256 }
  0x24   :  { %s58_s11 = sshll.u32 %s272_s10, 4  ;;  %p231_p2 = scmp.ne.s32.totalorder %s360_s2, %s230_s14  ;;  %s59_s11 = int_to_ptr.vmem [resolvable:$true] %s58_s11 }
  0x25   :  { %p234_p3 = scmp.lt.u32.totalorder %s230_s14, %s360_s2 }
  0x27   :  { %p236_p4 = pnand %p234_p3, %p231_p2 }
  0x29   :  { %239 = shalt.err (!%p236_p4)
}
  0x2a   :  { %s240_s20 = scalar_lea.vmem %s59_s11, 256  ;;  %p245_p6 = scmp.lt.s32.totalorder %s59_s11, %s59_s11 }
  0x2b   :  { %p241_p5 = scmp.ne.s32.totalorder %s59_s11, %s240_s20  ;;  %p246_p7 = scmp.lt.s32.totalorder %s240_s20, %s240_s20 }
  0x2d   :  { %p247_p8 = por %p246_p7, %p245_p6 }
  0x2f   :  { %p248_p9 = pnand %p247_p8, %p241_p5 }
  0x31   :  { %251 = shalt.err (!%p248_p9)
}
  0x32   :  { %64 = dma.hbm_to_vmem [thread:$0]  %s360_s2, 256, %s59_s11, [#allocation7], %s270_s24, %s270_s24, %s271_s25  }
  0x33   :  { %262 = dma.done.wait [#allocation4], 256  }
  0x34   :  { %263 = vsyncadd [#allocation4], 4294967040 }
  0x35   :  { %264 = dma.done.wait [#allocation7], 512  }
  0x36   :  { %265 = vsyncadd [#allocation7], 4294966784  ;;  %v93_v0 = vld [vmem:[#allocation6] sm:$0xff]  ;;  %v94_v1 = vld [vmem:[#allocation6 + $0x8] sm:$0xff]  ;;  %v117_v6 = vlaneseq  ;;  %s252_s24 = scalar_lea.hbm %s361_s3, 16 }
  0x37   :  { %v97_v2 = vmul.f32 2.0, %v93_v0  ;;  %v98_v3 = vmul.f32 2.0, %v94_v1  ;;  %v91_v10 = vld [vmem:[#allocation3] sm:$0xff]  ;;  %v92_v12 = vld [vmem:[#allocation3 + $0x8] sm:$0xff]  ;;  %p253_p10 = scmp.ne.s32.totalorder %s361_s3, %s252_s24  ;;  %p256_p11 = scmp.lt.u32.totalorder %s252_s24, %s361_s3 }
  0x38   :  { %v118_v9 = vshrl.u32 %v117_v6, 7  ;;  %v95_v11 = vld [vmem:[#allocation8] sm:$0xff]  ;;  %v96_v13 = vld [vmem:[#allocation8 + $0x8] sm:$0xff]  ;;  %v121_v17 = vand.u32 127, %v117_v6 }
  0x39   :  { %v101_v4 = vsub.f32 0.0, %v97_v2  ;;  %v102_v5 = vsub.f32 0.0, %v98_v3  ;;  %v99_v15 = vsub.f32 %v91_v10, %v95_v11  ;;  %v100_v16 = vsub.f32 %v92_v12, %v96_v13  ;;  %p258_p12 = pnand %p256_p11, %p253_p10 }
  0x3a   :  { %v119_v14 = vadd.s32 8, %v118_v9  ;;  %v125_v18 = vmul.u32 128, %v118_v9 }
  0x3b   :  { %v103_v7 = vmul.f32 1.442695, %v101_v4  ;;  %v105_v8 = vmul.f32 1.442695, %v102_v5 }
  0x3c   :  { %v126_v19 = vmul.u32 128, %v119_v14  ;;  %v127_v24 = vadd.s32 %v125_v18, %v121_v17 }
  0x3d   :  { %182 = vpow2.f32 %v103_v7 }
  0x3e   :  { %184 = vpow2.f32 %v105_v8  ;;  %v128_v26 = vadd.s32 %v126_v19, %v121_v17  ;;  %vm129_vm0 = vcmp.lt.s32.totalorder %v127_v24, 2048 }
  0x40   :  { %vm130_vm1 = vcmp.lt.s32.totalorder %v128_v26, 2048 }
  0x47   :  { %v183_v20 = vpop.eup %182 }
  0x48   :  { %v185_v21 = vpop.eup %184  ;;  %v107_v22 = vmul.f32 %v183_v20, %v99_v15 }
  0x49   :  { %v108_v23 = vmul.f32 %v185_v21, %v100_v16 }
  0x4a   :  { %v109_v25 = vmul.f32 %v107_v22, %v99_v15 }
  0x4b   :  { %v110_v27 = vmul.f32 %v108_v23, %v100_v16 }
  0x4c   :  { %v111_v28 = vadd.f32 %v109_v25, %v97_v2 }
  0x4d   :  { %v112_v29 = vadd.f32 %v110_v27, %v98_v3 }
  0x4e   :  { %v113_v30 = vmul.f32 0.5, %v111_v28 }
  0x4f   :  { %v114_v31 = vmul.f32 0.5, %v112_v29 }
  0x50   :  { %v131_v32 = vsel %vm129_vm0, %v113_v30, 0.0 }
  0x51   :  { %v132_v33 = vsel %vm130_vm1, %v114_v31, 0.0 }
  0x52   :  { %v134_v34 = vadd.f32 %v132_v33, %v131_v32 }
  0x54   :  { %141 = vadd.xlane.f32.xlu0 %v134_v34 }
  0xe1   :  { %v142_v35 = vpop.xlane.xlu0 %141 }
  0xe2   :  { %v143_v36 = vrot.slane %v142_v35, 4 }
  0xe4   :  { %v144_v37 = vadd.f32 %v143_v36, %v142_v35 }
  0xe6   :  { %v145_v38 = vrot.slane %v144_v37, 2 }
  0xe8   :  { %v146_v39 = vadd.f32 %v145_v38, %v144_v37 }
  0xea   :  { %v147_v40 = vrot.slane %v146_v39, 1 }
  0xec   :  { %v148_v41 = vadd.f32 %v147_v40, %v146_v39 }
  0xee   :  { %174 = vpush %v148_v41 }
 0x11f   :  { %s175_s2 = spop %174 }
 0x120   :  { %s150_s21 = smul.f32 0.00048828125, %s175_s2 }
 0x122   :  { %152 = sst [smem:[#allocation9]] %s150_s21 }
 0x123   :  { %261 = shalt.err (!%p258_p12)
}
 0x124   :  { %s273_s29 = smov [#allocation9]  }
 0x125   :  { %160 = dma.smem_to_hbm %s273_s29, 16, %s361_s3, [#allocation5]  }
 0x126   :  { %266 = dma.done.wait [#allocation5], 16  }
 0x127   :  { %267 = vsyncadd [#allocation5], 4294967280 }
 0x128   :  { %164 = sfence }
 0x129   :  { %165 = vsyncpa [#allocation4], 1 }
 0x12a   :  { %166 = vsyncpa [#allocation7], 1 }
 0x12b   :  { %167 = vsyncpa [#allocation5], 1 }

</bundles_post_ra>
